<compile_context>
chip_gen: v5e
topology: v5e:2x2
jax: 0.10.0
libtpu: 0.0.40
codegen_flags: <defaults>
</compile_context>

<pallas_src>
import functools

import jax
import jax.numpy as jnp
from jax import lax
from jax.experimental import pallas as pl
from jax.experimental.pallas import tpu as pltpu


# ---------------------------------------------------------------------------
# Helpers
# ---------------------------------------------------------------------------
def _round_up(n, m):
    return ((n + m - 1) // m) * m


def _pad_axis(x, axis, target):
    pad = target - x.shape[axis]
    if pad <= 0:
        return x
    widths = [(0, 0)] * x.ndim
    widths[axis] = (0, pad)
    return jnp.pad(x, widths)


def _pick_tile(total, target):
    """Largest multiple of 128 that divides `total` and is <= target."""
    t = min(target, total)
    while total % t != 0:
        t -= 128
    return t


def _vmem_limit(estimate_bytes):
    """Explicit scoped-VMEM limit only when the 32 MiB default is too small;
    capped at 64 MiB (v7x physical VMEM)."""
    default = 32 * 1024 * 1024
    if estimate_bytes <= default:
        return None
    return min(_round_up(int(estimate_bytes), 1 << 20), 64 * 1024 * 1024)


# ---------------------------------------------------------------------------
# Encoder stand-in: global average pool + linear projection
# ---------------------------------------------------------------------------
def encoder_kernel(x_ref, w_ref, y_ref, sum_ref, *, hw_real, n_ch):
    # x_ref:  [tB, C, tHW] bf16    w_ref: [C, E_pad] f32
    # y_ref:  [tB, E_pad]  bf16    sum_ref: [tB, C] f32 (per-channel GAP sums)
    s_idx = pl.program_id(1)

    @pl.when(s_idx == 0)
    def _init():
        sum_ref[...] = jnp.zeros_like(sum_ref)

    # Per-step work is just the lane reduction of this spatial tile (XLU);
    # the wide [tB, E_pad] projection is deferred to the finalize branch so
    # the memory-bound GAP loop does not rewrite a lane-wide accumulator.
    x = x_ref[...].astype(jnp.float32)
    sum_ref[...] += jnp.sum(x, axis=-1)

    @pl.when(s_idx == pl.num_programs(1) - 1)
    def _finalize():
        pooled = sum_ref[...] * (1.0 / hw_real)            # [tB, C]
        # K = n_ch (3/4) is pathological for the MXU: C rank-1 VPU FMAs, once.
        acc = pooled[:, 0:1] * w_ref[0:1, :]
        for c in range(1, n_ch):
            acc = acc + pooled[:, c:c + 1] * w_ref[c:c + 1, :]
        y_ref[...] = acc.astype(y_ref.dtype)


def encoder_apply(x, w_enc, *, tile_b=32, tile_hw=512):
    """x: [B, C, H, W] f32, w_enc: [C, E] f32.

    Returns the zero-padded bf16 feature map [B_pad, E_pad] (consumed directly
    by the MLP kernels) plus (B, E) for final slicing.
    """
    B, C, H, W = x.shape
    E = w_enc.shape[1]
    HW = H * W

    tile_b = min(tile_b, _round_up(B, 8))
    tile_hw = min(tile_hw, _round_up(HW, 128))
    B_pad = _round_up(B, tile_b)
    HW_pad = _round_up(HW, tile_hw)
    E_pad = _round_up(E, 128)

    # bf16 image stream: halves the dominant DMA of this memory-bound kernel.
    x_flat = _pad_axis(_pad_axis(x.reshape(B, C, HW), 0, B_pad), 2, HW_pad)
    x_flat = x_flat.astype(jnp.bfloat16)
    w_pad = _pad_axis(w_enc.astype(jnp.float32), 1, E_pad)

    n_b = B_pad // tile_b
    n_hw = HW_pad // tile_hw

    kernel = functools.partial(encoder_kernel, hw_real=float(HW), n_ch=C)
    flops = int(2 * B * C * HW + 2 * B * C * E)
    bytes_accessed = int(x_flat.size * 2 + w_pad.size * 4 + B_pad * E_pad * 2)

    y_pad = pl.pallas_call(
        kernel,
        out_shape=jax.ShapeDtypeStruct((B_pad, E_pad), jnp.bfloat16),
        grid_spec=pltpu.PrefetchScalarGridSpec(
            num_scalar_prefetch=0,
            grid=(n_b, n_hw),
            in_specs=[
                pl.BlockSpec((tile_b, C, tile_hw), lambda b, s: (b, 0, s)),
                # grid-invariant projection weight: single-buffered.
                pl.BlockSpec((C, E_pad), lambda b, s: (0, 0),
                             pipeline_mode=pl.Buffered(1)),
            ],
            out_specs=pl.BlockSpec((tile_b, E_pad), lambda b, s: (b, 0)),
            scratch_shapes=[pltpu.VMEM((tile_b, C), jnp.float32)],
        ),
        compiler_params=pltpu.CompilerParams(
            dimension_semantics=("parallel", "arbitrary")),
        cost_estimate=pl.CostEstimate(
            flops=flops, transcendentals=0, bytes_accessed=bytes_accessed),
    )(x_flat, w_pad)
    return y_pad, B, E


# ---------------------------------------------------------------------------
# MLP: Linear(bias=False) -> BatchNorm1d (train-mode stats) -> ReLU -> Linear
# split into two pipelined kernels.
# ---------------------------------------------------------------------------
def linear_bn_relu_kernel(x_ref, w1_ref, gamma_ref, beta_ref, hr_ref, *,
                          b_real, eps=1e-5):
    # x_ref:  [B_pad, D_pad] bf16 (resident, single-buffered)
    # w1_ref: [D_pad, tHd]   bf16
    # gamma/beta: [1, tHd]   f32
    # hr_ref: [B_pad, tHd]   bf16
    h = jnp.dot(x_ref[...], w1_ref[...],
                preferred_element_type=jnp.float32)        # [B_pad, tHd]

    # BatchNorm1d training-mode batch stats (biased variance), folded into a
    # single scale/shift.  Zero-padded batch rows are masked out of the stats.
    row = lax.broadcasted_iota(jnp.int32, (h.shape[0], 1), 0)
    mask = (row < b_real).astype(jnp.float32)
    inv_n = 1.0 / float(b_real)
    mean = jnp.sum(h * mask, axis=0, keepdims=True) * inv_n
    diff = (h - mean) * mask
    var = jnp.sum(diff * diff, axis=0, keepdims=True) * inv_n
    scale = gamma_ref[...] * lax.rsqrt(var + eps)          # rsqrt -> EUP
    shift = beta_ref[...] - mean * scale
    hr_ref[...] = jnp.maximum(h * scale + shift, 0.0).astype(hr_ref.dtype)


def matmul_bias_kernel(hr_ref, w2_ref, b2_ref, out_ref, acc_ref):
    # hr_ref: [B_pad, tHd] bf16   w2_ref: [tHd, tOd] bf16   b2_ref: [1, tOd] f32
    # out_ref: [B_pad, tOd] bf16  acc_ref: [B_pad, tOd] f32 (K-reduction)
    k = pl.program_id(1)

    @pl.when(k == 0)
    def _init():
        acc_ref[...] = jnp.zeros_like(acc_ref)

    acc_ref[...] += jnp.dot(hr_ref[...], w2_ref[...],
                            preferred_element_type=jnp.float32)

    @pl.when(k == pl.num_programs(1) - 1)
    def _finalize():
        out_ref[...] = (acc_ref[...] + b2_ref[...]).astype(out_ref.dtype)


def mlp_apply(x_pad, b_real, p, *, tile_od=256):
    """x_pad: [B_pad, D_pad] bf16 (zero-padded) -> [B_pad, Od_pad] bf16.

    (A) hr = ReLU(BN(x @ w1))  grid over hidden tiles (parallel)
    (B) out = hr @ w2 + b2     grid (out tiles [parallel], hidden [arbitrary])
    The split keeps x@w1 + BN computed exactly once per hidden tile (no
    recompute hazard when n_od > 1) and gives both kernels a parallel axis.
    """
    B_pad, D_pad = x_pad.shape
    assert x_pad.dtype == jnp.bfloat16
    assert D_pad == p["w1"].shape[0]
    Hd_pad = p["w1"].shape[1]
    Od_pad = p["w2"].shape[1]

    # VMEM-aware hidden tile (v7x only has 64 MiB): shrink when the resident
    # padded batch block gets large.
    t_hd = _pick_tile(Hd_pad, 512 if B_pad <= 512 else 256)
    t_od = _pick_tile(Od_pad, tile_od)
    n_hd = Hd_pad // t_hd
    n_od = Od_pad // t_od

    hidden, out_dim = p["hidden"], p["out_dim"]

    # ---- stage A: hr = ReLU(BN(x @ w1)) ------------------------------------
    est_a = (B_pad * D_pad * 2              # x, single-buffered (invariant)
             + 2 * D_pad * t_hd * 2         # w1 tile, double-buffered
             + 2 * B_pad * t_hd * 2         # hr out tile, double-buffered
             + 2 * 2 * t_hd * 4             # gamma / beta
             + 5 * B_pad * t_hd * 4)        # f32 temporaries headroom
    hr = pl.pallas_call(
        functools.partial(linear_bn_relu_kernel, b_real=b_real),
        out_shape=jax.ShapeDtypeStruct((B_pad, Hd_pad), jnp.bfloat16),
        grid_spec=pltpu.PrefetchScalarGridSpec(
            num_scalar_prefetch=0,
            grid=(n_hd,),
            in_specs=[
                # grid-invariant full padded batch: single-buffered.
                pl.BlockSpec((B_pad, D_pad), lambda k: (0, 0),
                             pipeline_mode=pl.Buffered(1)),
                pl.BlockSpec((D_pad, t_hd), lambda k: (0, k)),
                pl.BlockSpec((1, t_hd), lambda k: (0, k)),
                pl.BlockSpec((1, t_hd), lambda k: (0, k)),
            ],
            out_specs=pl.BlockSpec((B_pad, t_hd), lambda k: (0, k)),
        ),
        compiler_params=pltpu.CompilerParams(
            dimension_semantics=("parallel",),
            vmem_limit_bytes=_vmem_limit(est_a)),
        cost_estimate=pl.CostEstimate(
            flops=int(2 * b_real * D_pad * hidden + 8 * b_real * hidden),
            transcendentals=int(hidden),
            bytes_accessed=int(x_pad.size * 2 + p["w1"].size * 2
                               + B_pad * Hd_pad * 2)),
    )(x_pad, p["w1"], p["gamma"], p["beta"])

    # ---- stage B: out = hr @ w2 + b2 ---------------------------------------
    est_b = (2 * B_pad * t_hd * 2 + 2 * t_hd * t_od * 2
             + 2 * B_pad * t_od * 2 + B_pad * t_od * 4 + 2 * 2 * t_od * 4)
    out_pad = pl.pallas_call(
        matmul_bias_kernel,
        out_shape=jax.ShapeDtypeStruct((B_pad, Od_pad), jnp.bfloat16),
        grid_spec=pltpu.PrefetchScalarGridSpec(
            num_scalar_prefetch=0,
            grid=(n_od, n_hd),
            in_specs=[
                pl.BlockSpec((B_pad, t_hd), lambda j, k: (0, k)),
                pl.BlockSpec((t_hd, t_od), lambda j, k: (k, j)),
                pl.BlockSpec((1, t_od), lambda j, k: (0, j)),
            ],
            out_specs=pl.BlockSpec((B_pad, t_od), lambda j, k: (0, j)),
            scratch_shapes=[pltpu.VMEM((B_pad, t_od), jnp.float32)],
        ),
        compiler_params=pltpu.CompilerParams(
            dimension_semantics=("parallel", "arbitrary"),
            vmem_limit_bytes=_vmem_limit(est_b)),
        cost_estimate=pl.CostEstimate(
            flops=int(2 * b_real * hidden * out_dim),
            transcendentals=0,
            bytes_accessed=int(B_pad * Hd_pad * 2 * n_od + p["w2"].size * 2
                               + p["b2"].size * 4 + B_pad * Od_pad * 2)),
    )(hr, p["w2"], p["b2"])
    return out_pad


# ---------------------------------------------------------------------------
# SiameseArm forward
# ---------------------------------------------------------------------------
def siamese_arm_forward(x, params):
    """x: [B, C, H, W] (NCHW). Returns (y, z, h) like SiameseArm.forward."""
    B = x.shape[0]
    proj = params["projector"]
    pred = params["predictor"]

    # Padded bf16 activations flow directly between stages (no wrapper-side
    # slice / re-pad / re-cast HBM round trips).
    y_pad, _, E = encoder_apply(x, params["enc_w"])    # encoder(x)[0] stand-in
    z_pad = mlp_apply(y_pad, B, proj)                  # projector(y)
    h_pad = mlp_apply(z_pad, B, pred)                  # predictor(z)

    y = y_pad[:B, :E].astype(jnp.float32)
    z = z_pad[:B, :proj["out_dim"]].astype(jnp.float32)
    h = h_pad[:B, :pred["out_dim"]].astype(jnp.float32)
    return y, z, h


# ---------------------------------------------------------------------------
# Deterministic parameter construction
# ---------------------------------------------------------------------------
def make_mlp_params(key, in_dim, hidden, out_dim):
    k1, k2, k3 = jax.random.split(key, 3)
    d_pad = _round_up(in_dim, 128)
    h_pad = _round_up(hidden, 128)
    o_pad = _round_up(out_dim, 128)
    bound1 = 1.0 / jnp.sqrt(in_dim)
    bound2 = 1.0 / jnp.sqrt(hidden)
    w1 = jax.random.uniform(k1, (in_dim, hidden), jnp.float32, -bound1, bound1)
    w2 = jax.random.uniform(k2, (hidden, out_dim), jnp.float32, -bound2, bound2)
    b2 = jax.random.uniform(k3, (1, out_dim), jnp.float32, -bound2, bound2)
    return {
        "in_dim": in_dim, "hidden": hidden, "out_dim": out_dim,
        # [in, out] layout (x @ W == PyTorch x @ W.T), zero-padded to lane
        # multiples; matmul weights in bf16.
        "w1": _pad_axis(_pad_axis(w1, 0, d_pad), 1, h_pad).astype(jnp.bfloat16),
        "gamma": jnp.ones((1, h_pad), jnp.float32),    # BatchNorm1d defaults
        "beta": jnp.zeros((1, h_pad), jnp.float32),
        "w2": _pad_axis(_pad_axis(w2, 0, h_pad), 1, o_pad).astype(jnp.bfloat16),
        "b2": _pad_axis(b2, 1, o_pad),
    }


def make_params(key, in_ch, encoder_out_dim, hidden, out_dim):
    ke, kp, kq = jax.random.split(key, 3)
    return {
        "enc_w": jax.random.normal(ke, (in_ch, encoder_out_dim), jnp.float32) * 0.05,
        "projector": make_mlp_params(kp, encoder_out_dim, hidden, out_dim),
        "predictor": make_mlp_params(kq, out_dim, hidden, out_dim),
    }


if __name__ == "__main__":
    # Small shapes consistent with the module (scaled down from 2048/4096/256).
    B, C, H, W = 2, 4, 16, 16
    ENCODER_OUT = 32
    PROJ_HIDDEN = 64
    PROJ_OUT = 32

    key = jax.random.PRNGKey(0)
    kx, kp = jax.random.split(key)
    x = jax.random.normal(kx, (B, C, H, W), jnp.float32)
    params = make_params(kp, C, ENCODER_OUT, PROJ_HIDDEN, PROJ_OUT)

    y, z, h = siamese_arm_forward(x, params)
    jax.block_until_ready((y, z, h))

    assert y.shape == (B, ENCODER_OUT)
    assert z.shape == (B, PROJ_OUT)
    assert h.shape == (B, PROJ_OUT)
    assert bool(jnp.all(jnp.isfinite(y)))
    assert bool(jnp.all(jnp.isfinite(z)))
    assert bool(jnp.all(jnp.isfinite(h)))
    print("KERNEL_OK")
</pallas_src>

<mosaic_0001>
module attributes {stable_mosaic.version = 11 : i64} {
  func.func @encoder_kernel(%arg0: i32, %arg1: i32, %arg2: memref<8x4x256xbf16, #tpu.memory_space<vmem>>, %arg3: memref<4x128xf32, #tpu.memory_space<vmem>>, %arg4: memref<8x128xbf16, #tpu.memory_space<vmem>>, %arg5: memref<8x4xf32, #tpu.memory_space<vmem>>) attributes {dimension_semantics = [#tpu.dimension_semantics<parallel>, #tpu.dimension_semantics<arbitrary>], iteration_bounds = array<i64: 1, 1>, scalar_prefetch = 0 : i64, scratch_operands = 1 : i64, tpu.core_type = #tpu.core_type<tc>, window_params = [{transform_indices = @transform_0, window_bounds = array<i64: 8, 4, 256>}, {pipeline_mode = #tpu.pipeline_mode<synchronous>, transform_indices = @transform_1, window_bounds = array<i64: 4, 128>}, {transform_indices = @transform_2, window_bounds = array<i64: 8, 128>}]} {
    %c0_i32 = arith.constant 0 : i32
    %0 = arith.cmpi eq, %arg1, %c0_i32 : i32
    %1 = arith.extui %0 : i1 to i32
    %c0_i32_0 = arith.constant 0 : i32
    %2 = arith.cmpi ne, %1, %c0_i32_0 : i32
    scf.if %2 {
      %cst_9 = arith.constant 0.000000e+00 : f32
      %12 = vector.broadcast %cst_9 : f32 to vector<8x4xf32>
      %c0_10 = arith.constant 0 : index
      %c0_11 = arith.constant 0 : index
      %13 = vector.load %arg5[%c0_10, %c0_11] : memref<8x4xf32, #tpu.memory_space<vmem>>, vector<8x4xf32>
      tpu.vector_store %arg5[%c0_10, %c0_11], %12 {strides = array<i32>} : memref<8x4xf32, #tpu.memory_space<vmem>>, vector<8x4xf32>,
    } else {
    }
    %c0 = arith.constant 0 : index
    %c0_1 = arith.constant 0 : index
    %c0_2 = arith.constant 0 : index
    %3 = vector.load %arg2[%c0, %c0_1, %c0_2] : memref<8x4x256xbf16, #tpu.memory_space<vmem>>, vector<8x4x256xbf16>
    %4 = arith.extf %3 : vector<8x4x256xbf16> to vector<8x4x256xf32>
    %c0_3 = arith.constant 0 : index
    %c0_4 = arith.constant 0 : index
    %5 = vector.load %arg5[%c0_3, %c0_4] : memref<8x4xf32, #tpu.memory_space<vmem>>, vector<8x4xf32>
    %cst = arith.constant dense<0.000000e+00> : vector<8x4xf32>
    %6 = vector.multi_reduction <add>, %4, %cst [2] : vector<8x4x256xf32> to vector<8x4xf32>
    %7 = arith.addf %5, %6 : vector<8x4xf32>
    %c0_5 = arith.constant 0 : index
    %c0_6 = arith.constant 0 : index
    %8 = vector.load %arg5[%c0_5, %c0_6] : memref<8x4xf32, #tpu.memory_space<vmem>>, vector<8x4xf32>
    tpu.vector_store %arg5[%c0_5, %c0_6], %7 {strides = array<i32>} : memref<8x4xf32, #tpu.memory_space<vmem>>, vector<8x4xf32>,
    %c0_i32_7 = arith.constant 0 : i32
    %9 = arith.cmpi eq, %arg1, %c0_i32_7 : i32
    %10 = arith.extui %9 : i1 to i32
    %c0_i32_8 = arith.constant 0 : i32
    %11 = arith.cmpi ne, %10, %c0_i32_8 : i32
    scf.if %11 {
      %c0_9 = arith.constant 0 : index
      %c0_10 = arith.constant 0 : index
      %12 = vector.load %arg5[%c0_9, %c0_10] : memref<8x4xf32, #tpu.memory_space<vmem>>, vector<8x4xf32>
      %cst_11 = arith.constant 3.906250e-03 : f32
      %13 = vector.broadcast %cst_11 : f32 to vector<8x4xf32>
      %14 = arith.mulf %12, %13 : vector<8x4xf32>
      %15 = vector.extract_strided_slice %14 {offsets = [0, 0], sizes = [8, 1], strides = [1, 1]} : vector<8x4xf32> to vector<8x1xf32>
      %c0_12 = arith.constant 0 : index
      %c0_13 = arith.constant 0 : index
      %16 = vector.load %arg3[%c0_12, %c0_13] : memref<4x128xf32, #tpu.memory_space<vmem>>, vector<1x128xf32>
      %17 = vector.broadcast %15 : vector<8x1xf32> to vector<8x128xf32>
      %18 = vector.broadcast %16 : vector<1x128xf32> to vector<8x128xf32>
      %19 = arith.mulf %17, %18 : vector<8x128xf32>
      %20 = vector.extract_strided_slice %14 {offsets = [0, 1], sizes = [8, 1], strides = [1, 1]} : vector<8x4xf32> to vector<8x1xf32>
      %c1 = arith.constant 1 : index
      %c0_14 = arith.constant 0 : index
      %21 = vector.load %arg3[%c1, %c0_14] : memref<4x128xf32, #tpu.memory_space<vmem>>, vector<1x128xf32>
      %22 = vector.broadcast %20 : vector<8x1xf32> to vector<8x128xf32>
      %23 = vector.broadcast %21 : vector<1x128xf32> to vector<8x128xf32>
      %24 = arith.mulf %22, %23 : vector<8x128xf32>
      %25 = arith.addf %19, %24 : vector<8x128xf32>
      %26 = vector.extract_strided_slice %14 {offsets = [0, 2], sizes = [8, 1], strides = [1, 1]} : vector<8x4xf32> to vector<8x1xf32>
      %c2 = arith.constant 2 : index
      %c0_15 = arith.constant 0 : index
      %27 = vector.load %arg3[%c2, %c0_15] : memref<4x128xf32, #tpu.memory_space<vmem>>, vector<1x128xf32>
      %28 = vector.broadcast %26 : vector<8x1xf32> to vector<8x128xf32>
      %29 = vector.broadcast %27 : vector<1x128xf32> to vector<8x128xf32>
      %30 = arith.mulf %28, %29 : vector<8x128xf32>
      %31 = arith.addf %25, %30 : vector<8x128xf32>
      %32 = vector.extract_strided_slice %14 {offsets = [0, 3], sizes = [8, 1], strides = [1, 1]} : vector<8x4xf32> to vector<8x1xf32>
      %c3 = arith.constant 3 : index
      %c0_16 = arith.constant 0 : index
      %33 = vector.load %arg3[%c3, %c0_16] : memref<4x128xf32, #tpu.memory_space<vmem>>, vector<1x128xf32>
      %34 = vector.broadcast %32 : vector<8x1xf32> to vector<8x128xf32>
      %35 = vector.broadcast %33 : vector<1x128xf32> to vector<8x128xf32>
      %36 = arith.mulf %34, %35 : vector<8x128xf32>
      %37 = arith.addf %31, %36 : vector<8x128xf32>
      %38 = arith.truncf %37 : vector<8x128xf32> to vector<8x128xbf16>
      %c0_17 = arith.constant 0 : index
      %c0_18 = arith.constant 0 : index
      %39 = vector.load %arg4[%c0_17, %c0_18] : memref<8x128xbf16, #tpu.memory_space<vmem>>, vector<8x128xbf16>
      tpu.vector_store %arg4[%c0_17, %c0_18], %38 {strides = array<i32>} : memref<8x128xbf16, #tpu.memory_space<vmem>>, vector<8x128xbf16>,
    } else {
    }
    return
  }
  func.func @transform_0(%arg0: i32, %arg1: i32) -> (i32, i32, i32) {
    %c0_i32 = arith.constant 0 : i32
    %c0_i32_0 = arith.constant 0 : i32
    return %arg0, %c0_i32, %arg1 : i32, i32, i32
  }
  func.func @transform_1(%arg0: i32, %arg1: i32) -> (i32, i32) {
    %c0_i32 = arith.constant 0 : i32
    %c0_i32_0 = arith.constant 0 : i32
    %c0_i32_1 = arith.constant 0 : i32
    return %c0_i32, %c0_i32_0 : i32, i32
  }
  func.func @transform_2(%arg0: i32, %arg1: i32) -> (i32, i32) {
    %c0_i32 = arith.constant 0 : i32
    %c0_i32_0 = arith.constant 0 : i32
    return %arg0, %c0_i32 : i32, i32
  }
}

</mosaic_0001>

<bundles_post_ra>
// kernel: tpu_custom_call.1
= control target key start
LH: loop header
LB: loop body
LE: loop exit
PB: predicated region body
PF: predicated region fallthrough
CT: control target
= control target key end

     0   :  { %7 = vsyncpa [#allocation4], 0  ;;  %s418_s0 = inlined_call_operand.hbm [shape: bf16[8,4,256], index: 0, kind: input, shape index: {}]   ;;  %s419_s1 = inlined_call_operand.hbm [shape: f32[4,128], index: 1, kind: input, shape index: {}]   ;;  %s420_s2 = inlined_call_operand.hbm [shape: bf16[8,128], index: 2, kind: output, shape index: {}]  }
   0x1   :  { %8 = vsyncpa [#allocation7], 0 }
   0x2   :  { %9 = vsyncpa [#allocation5], 0  ;;  %s14_s11 = sshll.u32 %s418_s0, 4  ;;  %s366_s12 = smov [#allocation3]   ;;  %s15_s11 = int_to_ptr.hbm [resolvable:$true] %s14_s11 }
   0x3   :  { %s16_s13 = sshll.u32 %s366_s12, 4  ;;  %s28_s16 = sshll.u32 %s419_s1, 4  ;;  %s17_s13 = int_to_ptr.vmem [resolvable:$true] %s16_s13  ;;  %s29_s16 = int_to_ptr.hbm [resolvable:$true] %s28_s16 }
   0x4   :  { %s367_s17 = smov 64   ;;  %s368_s18 = smov 4  }
   0x5   :  { %22 = dma.hbm_to_vmem [thread:$0]  %s15_s11, 512, %s17_s13, [#allocation4], %s367_s17, %s367_s17, %s368_s18  }
   0x6   :  { %s369_s19 = smov [#allocation6]  }
   0x7   :  { %s30_s20 = sshll.u32 %s369_s19, 4  ;;  %s31_s20 = int_to_ptr.vmem [resolvable:$true] %s30_s20 }
   0x8   :  { %33 = dma.hbm_to_vmem [thread:$0]  %s29_s16, 64, %s31_s20, [#allocation7]  }
   0x9   :  { %360 = dma.done.wait [#allocation4], 512  }
   0xa   :  { %361 = vsyncadd [#allocation4], 4294966784 }
   0xb   :  { %362 = dma.done.wait [#allocation7], 64  }
   0xc   :  { %363 = vsyncadd [#allocation7], 4294967232  ;;  %v251_v0 = vld [vmem:[#allocation3] sm:$0xff]   ;;  %v266_v1 = vld [vmem:[#allocation3 + $0x8] sm:$0xff]   ;;  %vm116_vm0 = vcmask 1043456   ;;  %vm46_vm1 = vcmask 31744   ;;  %v165_v57 = vlaneseq }
   0xd   :  { %v252_v2 = vunpack.c.l.bf16 %v251_v0  ;;  %v256_v3 = vunpack.c.l.bf16 %v266_v1  ;;  %v253_v4 = vunpack.c.h.bf16 %v251_v0  ;;  %v257_v5 = vunpack.c.h.bf16 %v266_v1  ;;  %v267_v6 = vld [vmem:[#allocation3 + $0x10] sm:$0xff]   ;;  %v268_v7 = vld [vmem:[#allocation3 + $0x18] sm:$0xff]   ;;  %s375_s0 = smov [#allocation8]   ;;  %s239_s23 = sshll.u32 %s420_s2, 4  ;;  %s240_s23 = int_to_ptr.hbm [resolvable:$true] %s239_s23 }
   0xe   :  { %v260_v8 = vunpack.c.l.bf16 %v267_v6  ;;  %v264_v9 = vunpack.c.l.bf16 %v268_v7  ;;  %v261_v14 = vunpack.c.h.bf16 %v267_v6  ;;  %v265_v20 = vunpack.c.h.bf16 %v268_v7  ;;  %s237_s1 = sshll.u32 %s375_s0, 4  ;;  %s238_s1 = int_to_ptr.vmem [resolvable:$true] %s237_s1 }
   0xf   :  { %73 = vst [vmem:[#allocation1] ss:$2 sm:$0xff] %v252_v2  ;;  %v370_v52 = vmov 0.0   ;;  %v371_v53 = vmov 2   ;;  %v372_v54 = vmov 1   ;;  %v373_v55 = vmov 0  }
  0x10   :  { %81 = vst [vmem:[#allocation1 + $0x20] ss:$2 sm:$0xff] %v256_v3  ;;  %281 = vset.pattern.permute.xlu1 %v371_v53  ;;  %280 = vset.pattern.permute.xlu0 %v372_v54  ;;  %v166_v59 = vand.u32 127, %v165_v57  ;;  %vm175_vm2 = vcmask 1041409   ;;  %vm177_vm3 = vcmask 1042434   ;;  %vm179_vm4 = vcmask 1043459  }
  0x11   :  { %77 = vst [vmem:[#allocation1 + $0x10] ss:$2 sm:$0xff] %v253_v4  ;;  %279 = vset.pattern.permute.xlu2 %v373_v55  ;;  %vm181_vm5 = vcmask 1044484   ;;  %vm183_vm6 = vcmask 1045509   ;;  %vm185_vm7 = vcmask 1046534   ;;  %vm187_vm8 = vcmask 1047559  }
  0x12   :  { %85 = vst [vmem:[#allocation1 + $0x30] ss:$2 sm:$0xff] %v257_v5 }
  0x13   :  { %47 = vst.msk [vmem:[#allocation2] sm:$0xff] %vm46_vm1, %v370_v52 }
  0x16   :  { %v74_v10 = vld.sshfl [vmem:[#allocation1] sm:$0xff pattern:$0x75316420]  ;;  %v75_v11 = vld.sshfl [vmem:[#allocation1 + $0x8] sm:$0xff pattern:$0x75316420] }
  0x17   :  { %v117_v12 = vsel %vm116_vm0, %v74_v10, 0.0  ;;  %v118_v13 = vsel %vm116_vm0, %v75_v11, 0.0  ;;  %88 = vst [vmem:[#allocation1] ss:$2 sm:$0xff] %v260_v8 }
  0x18   :  { %v119_v15 = vadd.f32 %v118_v13, %v117_v12  ;;  %v82_v16 = vld.sshfl [vmem:[#allocation1 + $0x20] sm:$0xff pattern:$0x75316420]  ;;  %v83_v17 = vld.sshfl [vmem:[#allocation1 + $0x28] sm:$0xff pattern:$0x75316420] }
  0x19   :  { %v127_v18 = vsel %vm116_vm0, %v82_v16, 0.0  ;;  %v128_v19 = vsel %vm116_vm0, %v83_v17, 0.0  ;;  %94 = vst [vmem:[#allocation1 + $0x20] ss:$2 sm:$0xff] %v264_v9 }
  0x1a   :  { %120 = vadd.xlane.f32.xlu0 %v119_v15  ;;  %v129_v21 = vadd.f32 %v128_v19, %v127_v18  ;;  %v78_v22 = vld.sshfl [vmem:[#allocation1 + $0x10] sm:$0xff pattern:$0x75316420]  ;;  %v79_v23 = vld.sshfl [vmem:[#allocation1 + $0x18] sm:$0xff pattern:$0x75316420] }
  0x1b   :  { %91 = vst [vmem:[#allocation1 + $0x10] ss:$2 sm:$0xff] %v261_v14  ;;  %v122_v24 = vsel %vm116_vm0, %v78_v22, 0.0  ;;  %v123_v25 = vsel %vm116_vm0, %v79_v23, 0.0  ;;  %v64_v14 = vld [vmem:[#allocation2] sm:$0xff] }
  0x1c   :  { %130 = vadd.xlane.f32.xlu1 %v129_v21  ;;  %v86_v26 = vld.sshfl [vmem:[#allocation1 + $0x30] sm:$0xff pattern:$0x75316420]  ;;  %v87_v27 = vld.sshfl [vmem:[#allocation1 + $0x38] sm:$0xff pattern:$0x75316420]  ;;  %v124_v30 = vadd.f32 %v123_v25, %v122_v24 }
  0x1d   :  { %97 = vst [vmem:[#allocation1 + $0x30] ss:$2 sm:$0xff] %v265_v20  ;;  %v132_v28 = vsel %vm116_vm0, %v86_v26, 0.0  ;;  %v133_v29 = vsel %vm116_vm0, %v87_v27, 0.0  ;;  %v374_v21 = vmov 3  }
  0x1e   :  { %v89_v31 = vld.sshfl [vmem:[#allocation1] sm:$0xff pattern:$0x75316420]  ;;  %v90_v32 = vld.sshfl [vmem:[#allocation1 + $0x8] sm:$0xff pattern:$0x75316420]  ;;  %v134_v36 = vadd.f32 %v133_v29, %v132_v28 }
  0x1f   :  { %v137_v33 = vsel %vm116_vm0, %v89_v31, 0.0  ;;  %v138_v34 = vsel %vm116_vm0, %v90_v32, 0.0  ;;  %v284_v23 = vld [vmem:[#allocation6] ss:$0 sm:$0xff]  ;;  %v287_v24 = vld [vmem:[#allocation6 + $0x1] ss:$0 sm:$0xff] }
  0x20   :  { %v139_v35 = vadd.f32 %v138_v34, %v137_v33  ;;  %v95_v37 = vld.sshfl [vmem:[#allocation1 + $0x20] sm:$0xff pattern:$0x75316420]  ;;  %v96_v38 = vld.sshfl [vmem:[#allocation1 + $0x28] sm:$0xff pattern:$0x75316420] }
  0x21   :  { %v147_v43 = vsel %vm116_vm0, %v95_v37, 0.0  ;;  %v148_v44 = vsel %vm116_vm0, %v96_v38, 0.0  ;;  %v286_v25 = vld [vmem:[#allocation6 + $0x2] ss:$0 sm:$0xff]  ;;  %v285_v29 = vld [vmem:[#allocation6 + $0x3] ss:$0 sm:$0xff] }
  0x22   :  { %125 = vadd.xlane.f32.xlu0 %v124_v30  ;;  %140 = vadd.xlane.f32.xlu2 %v139_v35  ;;  %v92_v39 = vld.sshfl [vmem:[#allocation1 + $0x10] sm:$0xff pattern:$0x75316420]  ;;  %v93_v40 = vld.sshfl [vmem:[#allocation1 + $0x18] sm:$0xff pattern:$0x75316420]  ;;  %v149_v50 = vadd.f32 %v148_v44, %v147_v43 }
  0x23   :  { %v142_v41 = vsel %vm116_vm0, %v92_v39, 0.0  ;;  %v143_v42 = vsel %vm116_vm0, %v93_v40, 0.0 }
  0x24   :  { %135 = vadd.xlane.f32.xlu1 %v134_v36  ;;  %v98_v45 = vld.sshfl [vmem:[#allocation1 + $0x30] sm:$0xff pattern:$0x75316420]  ;;  %v99_v46 = vld.sshfl [vmem:[#allocation1 + $0x38] sm:$0xff pattern:$0x75316420]  ;;  %v144_v49 = vadd.f32 %v143_v42, %v142_v41 }
  0x25   :  { %v152_v47 = vsel %vm116_vm0, %v98_v45, 0.0  ;;  %v153_v48 = vsel %vm116_vm0, %v99_v46, 0.0 }
  0x26   :  { %v154_v51 = vadd.f32 %v153_v48, %v152_v47 }
  0x2a   :  { %145 = vadd.xlane.f32.xlu2 %v144_v49  ;;  %150 = vadd.xlane.f32.xlu0 %v149_v50 }
  0x2c   :  { %155 = vadd.xlane.f32.xlu1 %v154_v51 }
  0x8d   :  { %v121_v56 = vpop.xlane.xlu0 %120 }
  0x8e   :  { %v167_v62 = vperm.slane %v121_v56, %v166_v59 }
  0x8f   :  { %v131_v58 = vpop.xlane.xlu1 %130 }
  0x90   :  { %v169_v0 = vperm.slane %v131_v58, %v166_v59 }
  0x95   :  { %v126_v60 = vpop.xlane.xlu0 %125  ;;  %v141_v61 = vpop.xlane.xlu2 %140 }
  0x96   :  { %v168_v63 = vperm.slane %v126_v60, %v166_v59  ;;  %v171_v6 = vperm.slane %v141_v61, %v166_v59 }
  0x97   :  { %v136_v1 = vpop.xlane.xlu1 %135 }
  0x98   :  { %v176_v2 = vsel %vm175_vm2, %v168_v63, %v167_v62  ;;  %v170_v3 = vperm.slane %v136_v1, %v166_v59 }
  0x99   :  { %v178_v4 = vsel %vm177_vm3, %v169_v0, %v176_v2 }
  0x9a   :  { %v180_v5 = vsel %vm179_vm4, %v170_v3, %v178_v4 }
  0x9b   :  { %v182_v11 = vsel %vm181_vm5, %v171_v6, %v180_v5 }
  0x9d   :  { %v146_v7 = vpop.xlane.xlu2 %145  ;;  %v151_v8 = vpop.xlane.xlu0 %150 }
  0x9e   :  { %v172_v9 = vperm.slane %v146_v7, %v166_v59  ;;  %v173_v10 = vperm.slane %v151_v8, %v166_v59 }
  0x9f   :  { %v156_v12 = vpop.xlane.xlu1 %155 }
  0xa0   :  { %v184_v13 = vsel %vm183_vm6, %v172_v9, %v182_v11  ;;  %v174_v15 = vperm.slane %v156_v12, %v166_v59 }
  0xa1   :  { %v186_v16 = vsel %vm185_vm7, %v173_v10, %v184_v13 }
  0xa2   :  { %v188_v17 = vsel %vm187_vm8, %v174_v15, %v186_v16 }
  0xa3   :  { %v190_v18 = vadd.f32 %v188_v17, %v64_v14 }
  0xa5   :  { %192 = vst.msk [vmem:[#allocation2] sm:$0xff] %vm46_vm1, %v190_v18 }
  0xac   :  { %v196_v19 = vld [vmem:[#allocation2] sm:$0xff] }
  0xad   :  { %v197_v20 = vmul.f32 0.00390625, %v196_v19 }
  0xaf   :  { %216 = vperm.xlu1 %281, %v197_v20   ;;  %208 = vperm.xlu0 %280, %v197_v20  }
  0xb0   :  { %201 = vperm.xlu2 %279, %v197_v20  }
  0xb7   :  { %283 = vset.pattern.permute.xlu0 %v374_v21 }
  0xb8   :  { %282 = vset.pattern.permute.xlu2 %v374_v21 }
  0xb9   :  { %224 = vperm.xlu2 %282, %v197_v20  }
 0x10a   :  { %v202_v22 = vpop.permute.xlu2 %201 }
 0x10b   :  { %v205_v28 = vmul.f32 %v284_v23, %v202_v22 }
 0x113   :  { %v225_v31 = vpop.permute.xlu2 %224 }
 0x114   :  { %v228_v34 = vmul.f32 %v285_v29, %v225_v31 }
 0x121   :  { %v217_v26 = vpop.permute.xlu1 %216  ;;  %v209_v27 = vpop.permute.xlu0 %208 }
 0x122   :  { %v212_v30 = vmul.f32 %v287_v24, %v209_v27  ;;  %v220_v32 = vmul.f32 %v286_v25, %v217_v26 }
 0x124   :  { %v213_v33 = vadd.f32 %v212_v30, %v205_v28 }
 0x126   :  { %v221_v35 = vadd.f32 %v220_v32, %v213_v33 }
 0x128   :  { %v229_v36 = vadd.f32 %v228_v34, %v221_v35 }
 0x12a   :  { %v230_v37 = vpack.c.bf16 %v229_v36, %v229_v36 }
 0x12c   :  { %231 = vst [vmem:[#allocation8] sm:$0xf] %v230_v37 }
 0x12d   :  { %242 = dma.vmem_to_hbm [thread:$0]  %s238_s1, 64, %s240_s23, [#allocation5]  }
 0x12e   :  { %364 = dma.done.wait [#allocation5], 64  }
 0x12f   :  { %365 = vsyncadd [#allocation5], 4294967232 }
 0x130   :  { %247 = vsyncpa [#allocation4], 1 }
 0x131   :  { %248 = vsyncpa [#allocation7], 1 }
 0x132   :  { %249 = vsyncpa [#allocation5], 1 }

</bundles_post_ra>
